<compile_context>
chip_gen: v7x
topology: tpu7x:2x2x1
jax: 0.10.0
libtpu: 0.0.40
codegen_flags: <defaults>
</compile_context>

<pallas_src>
import functools

import numpy as np
import jax
import jax.numpy as jnp
from jax import lax
from jax.experimental import pallas as pl
from jax.experimental.pallas import tpu as pltpu


def _center_triplet_kernel(avg_ref, feats_ref, loss_ref, correct_ref, gram_ref,
                           *, margin, n, label_num, inv_chunk_sq):
    k = pl.program_id(0)

    @pl.when(k == 0)
    def _init():
        gram_ref[...] = jnp.zeros_like(gram_ref)

    # Raw (unscaled) chunk sums for this D-slab on the MXU:
    #   (n, batch) 0/1 matrix @ (batch, tile_d) feats slab -> (n, tile_d), f32 acc.
    c = lax.dot_general(avg_ref[...], feats_ref[...],
                        dimension_numbers=(((1,), (0,)), ((), ())),
                        preferred_element_type=jnp.float32)

    # Partial Gram of the raw centers (contract the feature slab).  This is the
    # only accumulator; squared norms come from its diagonal at the end.
    gram_ref[...] += lax.dot_general(c, c,
                                     dimension_numbers=(((1,), (1,)), ((), ())),
                                     preferred_element_type=jnp.float32)

    @pl.when(k == pl.num_programs(0) - 1)
    def _finalize():
        # Apply the 1/chunk^2 mean scale once, in f32 (exact for any chunk size
        # even when the matmul inputs are bf16).
        gram = gram_ref[...] * jnp.float32(inv_chunk_sq)          # (n, n)

        row = lax.broadcasted_iota(jnp.int32, (n, n), 0)
        col = lax.broadcasted_iota(jnp.int32, (n, n), 1)
        eye = (row == col).astype(jnp.float32)

        # Squared center norms straight off the Gram diagonal.
        diag_masked = gram * eye
        d_col = jnp.sum(diag_masked, axis=1, keepdims=True)       # (n, 1)
        d_row = jnp.sum(diag_masked, axis=0, keepdims=True)       # (1, n)
        dist2 = d_col + d_row - 2.0 * gram                        # (n, n)

        # Same-class mask rebuilt in-kernel: targets = [0..K-1, 0..K-1], so
        # targets[i] == targets[j]  <=>  i - j in {0, +K, -K}.
        diff = row - col
        same = (diff == 0) | (diff == label_num) | (diff == -label_num)

        neg_inf = jnp.float32(-jnp.inf)
        pos_inf = jnp.float32(jnp.inf)

        # max/min on squared distances (sqrt is monotone); sqrt only on (n, 1).
        ap2 = jnp.max(jnp.where(same, dist2, neg_inf), axis=1, keepdims=True)
        an2 = jnp.min(jnp.where(same, pos_inf, dist2), axis=1, keepdims=True)
        dist_ap = jnp.sqrt(jnp.maximum(ap2, 1e-12))
        dist_an = jnp.sqrt(jnp.maximum(an2, 1e-12))

        # MarginRankingLoss(margin)(dist_an, dist_ap, y=1)
        hinge = jnp.maximum(dist_ap - dist_an + jnp.float32(margin), 0.0)
        loss_ref[0] = jnp.sum(hinge) / jnp.float32(n)
        correct_ref[0] = jnp.sum((dist_an >= dist_ap).astype(jnp.int32))


def _vmem_capacity_bytes():
    """Per-TensorCore VMEM capacity; conservative (v7x) fallback if unknown."""
    try:
        return int(pltpu.get_tpu_info().vmem_capacity_bytes)
    except Exception:
        return 64 << 20


def _pick_tile_d(d, batch, itemsize, slab_budget):
    """Largest lane-aligned tile of D that divides D and fits the slab budget.

    Prefers the whole feature dimension (grid of a single step) whenever the
    full feats tensor fits the budget — the kernel is step-overhead bound at
    realistic CenterTripletLoss sizes, so fewer/larger steps win.
    """
    if batch * d * itemsize <= slab_budget:
        return d                      # whole feats in one step: grid=(1,)
    if d % 128 != 0:
        return d                      # single full-width block is the only legal tile
    best = 128
    t = 128
    while t <= d:
        if d % t == 0 and batch * t * itemsize <= slab_budget:
            best = t
        t *= 2
    return best


def center_triplet_loss(feats, labels, margin=0.3, use_bf16_matmul=None):
    """JAX/Pallas equivalent of CenterTripletLoss.forward.

    feats:  (batch, feat_dim) float array (f32 or bf16)
    labels: (batch,) int array.  As in the PyTorch original, only the number of
            unique labels matters; the batch is assumed chunked as
            [id_0..id_{K-1} | id_0..id_{K-1}] with equal-size chunks.
    use_bf16_matmul:
            None  -> bf16 MXU inputs iff feats is already bf16 (no extra cast pass)
            True  -> cast f32 feats to bf16 for the MXU (f32 accumulation;
                     recommended on v5e/v6e which have no native f32 MXU path)
            False -> force f32 matmul inputs (bit-exact vs the f32 reference)
    Returns (loss: f32 scalar, correct: i32 scalar).
    """
    labels_np = np.asarray(labels)
    # TODO(synk): labels.unique() has no dynamic-shape JAX equivalent; the unique
    # count is computed host-side (shapes must be static for chunking anyway).
    label_num = int(np.unique(labels_np).shape[0])
    n = 2 * label_num
    batch, dim = feats.shape
    assert batch % n == 0, "batch must be divisible by 2 * num_unique_labels"
    chunk = batch // n

    if use_bf16_matmul is None:
        use_bf16_matmul = (jnp.dtype(feats.dtype) == jnp.dtype(jnp.bfloat16))
    compute_dtype = jnp.bfloat16 if use_bf16_matmul else jnp.float32
    feats_in = feats if jnp.dtype(feats.dtype) == jnp.dtype(compute_dtype) \
        else feats.astype(compute_dtype)
    itemsize = jnp.dtype(compute_dtype).itemsize

    # Constant 0/1 block-selection matrix (chunk sums on the MXU); the 1/chunk
    # mean scale is folded into a single f32 multiply of the final Gram.
    rows = np.arange(n)[:, None]
    cols = np.arange(batch)[None, :]
    avg01 = ((cols // chunk) == rows).astype(np.float32)
    avg = jnp.asarray(avg01, dtype=compute_dtype)
    inv_chunk_sq = 1.0 / float(chunk * chunk)

    # Per-generation tiling / VMEM budget (v7x: 64 MiB, v5e/v6e: 128 MiB).
    vmem_cap = _vmem_capacity_bytes()
    slab_budget = max(4 << 20, min(vmem_cap // 6, 24 << 20))
    tile_d = _pick_tile_d(dim, batch, itemsize, slab_budget)
    num_k = dim // tile_d

    slab_bytes = batch * tile_d * itemsize
    resident_bytes = n * batch * itemsize               # avg matrix
    scratch_bytes = n * n * 4 + n * tile_d * 4          # gram acc + c temp
    est = 2 * slab_bytes + 2 * resident_bytes + scratch_bytes
    vmem_limit = int(min(max(2 * est, 16 << 20), max(16 << 20, int(0.6 * vmem_cap))))

    cost = pl.CostEstimate(
        flops=int(2 * n * dim * (batch + n)),
        transcendentals=int(2 * n),
        bytes_accessed=int(batch * dim * itemsize + n * batch * itemsize + 8),
    )

    kern = functools.partial(_center_triplet_kernel, margin=float(margin),
                             n=n, label_num=label_num, inv_chunk_sq=inv_chunk_sq)

    loss, correct = pl.pallas_call(
        kern,
        out_shape=(jax.ShapeDtypeStruct((1,), jnp.float32),
                   jax.ShapeDtypeStruct((1,), jnp.int32)),
        grid_spec=pltpu.PrefetchScalarGridSpec(
            num_scalar_prefetch=0,
            grid=(num_k,),
            in_specs=[
                pl.BlockSpec((n, batch), lambda k: (0, 0)),       # 0/1 averaging matrix
                pl.BlockSpec((batch, tile_d), lambda k: (0, k)),  # feats slab
            ],
            out_specs=(
                pl.BlockSpec(memory_space=pltpu.MemorySpace.SMEM),
                pl.BlockSpec(memory_space=pltpu.MemorySpace.SMEM),
            ),
            scratch_shapes=[
                pltpu.VMEM((n, n), jnp.float32),   # Gram accumulator
            ],
        ),
        compiler_params=pltpu.CompilerParams(
            dimension_semantics=("arbitrary",),
            vmem_limit_bytes=vmem_limit,
        ),
        cost_estimate=cost,
    )(avg, feats_in)
    return loss[0], correct[0]


def _reference(feats, label_num, margin):
    feats = np.asarray(feats, np.float32)
    n = 2 * label_num
    chunk = feats.shape[0] // n
    centers = feats.reshape(n, chunk, -1).mean(axis=1)
    d2 = ((centers[:, None, :] - centers[None, :, :]) ** 2).sum(-1)
    dist = np.sqrt(np.maximum(d2, 1e-12))
    targets = np.tile(np.arange(label_num), 2)
    mask = targets[:, None] == targets[None, :]
    ap = np.max(np.where(mask, dist, -np.inf), axis=1)
    an = np.min(np.where(mask, np.inf, dist), axis=1)
    loss = np.mean(np.maximum(ap - an + margin, 0.0))
    correct = int((an >= ap).sum())
    return loss, correct


if __name__ == "__main__":
    key = jax.random.PRNGKey(0)
    label_num = 4          # number of unique identities in the batch
    chunk = 2              # samples per (identity, modality) chunk
    n_centers = 2 * label_num
    batch = n_centers * chunk     # 16
    feat_dim = 384                # fits the slab budget -> single-step grid
    margin = 0.3

    feats = jax.random.normal(key, (batch, feat_dim), dtype=jnp.float32)
    # batch ordered as [id0..id3 (modality A), id0..id3 (modality B)], chunked.
    labels = jnp.asarray(np.tile(np.repeat(np.arange(label_num), chunk), 2),
                         dtype=jnp.int32)

    ref_loss, ref_correct = _reference(np.asarray(feats), label_num, margin)

    # f32 path: exact semantics of the PyTorch module.
    loss, correct = center_triplet_loss(feats, labels, margin=margin,
                                        use_bf16_matmul=False)
    loss, correct = jax.block_until_ready((loss, correct))
    assert np.allclose(float(loss), ref_loss, rtol=1e-4, atol=1e-5), (float(loss), ref_loss)
    assert int(correct) == ref_correct, (int(correct), ref_correct)

    # bf16-input path (native MXU rate on v5e/v6e, f32 accumulation).  `correct`
    # can legitimately flip on near-ties with bf16 inputs, so only the loss is
    # checked (loosely) and `correct` is range-checked.
    loss_bf, correct_bf = center_triplet_loss(feats.astype(jnp.bfloat16), labels,
                                              margin=margin)
    loss_bf, correct_bf = jax.block_until_ready((loss_bf, correct_bf))
    assert np.allclose(float(loss_bf), ref_loss, rtol=5e-2, atol=0.15), (float(loss_bf), ref_loss)
    assert 0 <= int(correct_bf) <= n_centers

    print("KERNEL_OK")
</pallas_src>

<mosaic_0001>
module attributes {stable_mosaic.version = 11 : i64} {
  func.func @_center_triplet_kernel(%arg0: i32, %arg1: memref<8x16xf32, #tpu.memory_space<vmem>>, %arg2: memref<16x384xf32, #tpu.memory_space<vmem>>, %arg3: memref<1xf32, #tpu.memory_space<smem>>, %arg4: memref<1xi32, #tpu.memory_space<smem>>, %arg5: memref<8x8xf32, #tpu.memory_space<vmem>>) attributes {dimension_semantics = [#tpu.dimension_semantics<arbitrary>], iteration_bounds = array<i64: 1>, scalar_prefetch = 0 : i64, scratch_operands = 1 : i64, tpu.core_type = #tpu.core_type<tc>, window_params = [{pipeline_mode = #tpu.pipeline_mode<synchronous>, transform_indices = @transform_0, window_bounds = array<i64: 8, 16>}, {transform_indices = @transform_1, window_bounds = array<i64: 16, 384>}, {transform_indices = @transform_2, window_bounds = array<i64: 1>}, {transform_indices = @transform_3, window_bounds = array<i64: 1>}]} {
    %c0_i32 = arith.constant 0 : i32
    %0 = arith.cmpi eq, %arg0, %c0_i32 : i32
    %1 = arith.extui %0 : i1 to i32
    %c0_i32_0 = arith.constant 0 : i32
    %2 = arith.cmpi ne, %1, %c0_i32_0 : i32
    scf.if %2 {
      %cst_11 = arith.constant 0.000000e+00 : f32
      %13 = vector.broadcast %cst_11 : f32 to vector<8x8xf32>
      %c0_12 = arith.constant 0 : index
      %c0_13 = arith.constant 0 : index
      %14 = vector.load %arg5[%c0_12, %c0_13] : memref<8x8xf32, #tpu.memory_space<vmem>>, vector<8x8xf32>
      tpu.vector_store %arg5[%c0_12, %c0_13], %13 {strides = array<i32>} : memref<8x8xf32, #tpu.memory_space<vmem>>, vector<8x8xf32>,
    } else {
    }
    %c0 = arith.constant 0 : index
    %c0_1 = arith.constant 0 : index
    %3 = vector.load %arg1[%c0, %c0_1] : memref<8x16xf32, #tpu.memory_space<vmem>>, vector<8x16xf32>
    %c0_2 = arith.constant 0 : index
    %c0_3 = arith.constant 0 : index
    %4 = vector.load %arg2[%c0_2, %c0_3] : memref<16x384xf32, #tpu.memory_space<vmem>>, vector<16x384xf32>
    %cst = arith.constant dense<0.000000e+00> : vector<8x384xf32>
    %5 = tpu.matmul %3, %4, %cst {dimension_numbers = #tpu.dot_dimension_numbers<[1], [0], [0], [1], [0, 0, 1, 1], [], []>} : vector<8x16xf32>, vector<16x384xf32>, vector<8x384xf32> -> vector<8x384xf32>
    %c0_4 = arith.constant 0 : index
    %c0_5 = arith.constant 0 : index
    %6 = vector.load %arg5[%c0_4, %c0_5] : memref<8x8xf32, #tpu.memory_space<vmem>>, vector<8x8xf32>
    %cst_6 = arith.constant dense<0.000000e+00> : vector<8x8xf32>
    %7 = tpu.matmul %5, %5, %cst_6 {dimension_numbers = #tpu.dot_dimension_numbers<[1], [1], [0], [0], [0, 0, 1, 0], [], []>} : vector<8x384xf32>, vector<8x384xf32>, vector<8x8xf32> -> vector<8x8xf32>
    %8 = arith.addf %6, %7 : vector<8x8xf32>
    %c0_7 = arith.constant 0 : index
    %c0_8 = arith.constant 0 : index
    %9 = vector.load %arg5[%c0_7, %c0_8] : memref<8x8xf32, #tpu.memory_space<vmem>>, vector<8x8xf32>
    tpu.vector_store %arg5[%c0_7, %c0_8], %8 {strides = array<i32>} : memref<8x8xf32, #tpu.memory_space<vmem>>, vector<8x8xf32>,
    %c0_i32_9 = arith.constant 0 : i32
    %10 = arith.cmpi eq, %arg0, %c0_i32_9 : i32
    %11 = arith.extui %10 : i1 to i32
    %c0_i32_10 = arith.constant 0 : i32
    %12 = arith.cmpi ne, %11, %c0_i32_10 : i32
    scf.if %12 {
      %c0_11 = arith.constant 0 : index
      %c0_12 = arith.constant 0 : index
      %13 = vector.load %arg5[%c0_11, %c0_12] : memref<8x8xf32, #tpu.memory_space<vmem>>, vector<8x8xf32>
      %cst_13 = arith.constant 2.500000e-01 : f32
      %14 = vector.broadcast %cst_13 : f32 to vector<8x8xf32>
      %15 = arith.mulf %13, %14 : vector<8x8xf32>
      %16 = tpu.iota {dimensions = array<i32: 0>} : vector<8x8xi32>
      %17 = tpu.iota {dimensions = array<i32: 1>} : vector<8x8xi32>
      %18 = arith.cmpi eq, %16, %17 : vector<8x8xi32>
      %19 = arith.extui %18 : vector<8x8xi1> to vector<8x8xi32>
      %20 = arith.sitofp %19 : vector<8x8xi32> to vector<8x8xf32>
      %21 = arith.mulf %15, %20 : vector<8x8xf32>
      %cst_14 = arith.constant dense<0.000000e+00> : vector<8xf32>
      %22 = vector.multi_reduction <add>, %21, %cst_14 [1] : vector<8x8xf32> to vector<8xf32>
      %23 = vector.shape_cast %22 : vector<8xf32> to vector<8x1xf32>
      %cst_15 = arith.constant dense<0.000000e+00> : vector<8xf32>
      %24 = vector.multi_reduction <add>, %21, %cst_15 [0] : vector<8x8xf32> to vector<8xf32>
      %25 = vector.shape_cast %24 : vector<8xf32> to vector<1x8xf32>
      %26 = vector.broadcast %23 : vector<8x1xf32> to vector<8x8xf32>
      %27 = vector.broadcast %25 : vector<1x8xf32> to vector<8x8xf32>
      %28 = arith.addf %26, %27 : vector<8x8xf32>
      %cst_16 = arith.constant 2.000000e+00 : f32
      %29 = vector.broadcast %cst_16 : f32 to vector<8x8xf32>
      %30 = arith.mulf %29, %15 : vector<8x8xf32>
      %31 = arith.subf %28, %30 : vector<8x8xf32>
      %32 = arith.subi %16, %17 : vector<8x8xi32>
      %c0_i32_17 = arith.constant 0 : i32
      %33 = vector.broadcast %c0_i32_17 : i32 to vector<8x8xi32>
      %34 = arith.cmpi eq, %32, %33 : vector<8x8xi32>
      %c4_i32 = arith.constant 4 : i32
      %35 = vector.broadcast %c4_i32 : i32 to vector<8x8xi32>
      %36 = arith.cmpi eq, %32, %35 : vector<8x8xi32>
      %37 = arith.ori %34, %36 : vector<8x8xi1>
      %c-4_i32 = arith.constant -4 : i32
      %38 = vector.broadcast %c-4_i32 : i32 to vector<8x8xi32>
      %39 = arith.cmpi eq, %32, %38 : vector<8x8xi32>
      %40 = arith.ori %37, %39 : vector<8x8xi1>
      %cst_18 = arith.constant 0xFF800000 : f32
      %41 = vector.broadcast %cst_18 : f32 to vector<8x8xf32>
      %42 = arith.select %40, %31, %41 : vector<8x8xi1>, vector<8x8xf32>
      %cst_19 = arith.constant dense<0xFF800000> : vector<8xf32>
      %43 = vector.multi_reduction <maximumf>, %42, %cst_19 [1] : vector<8x8xf32> to vector<8xf32>
      %44 = vector.shape_cast %43 : vector<8xf32> to vector<8x1xf32>
      %cst_20 = arith.constant 0x7F800000 : f32
      %45 = vector.broadcast %cst_20 : f32 to vector<8x8xf32>
      %46 = arith.select %40, %45, %31 : vector<8x8xi1>, vector<8x8xf32>
      %cst_21 = arith.constant dense<0x7F800000> : vector<8xf32>
      %47 = vector.multi_reduction <minimumf>, %46, %cst_21 [1] : vector<8x8xf32> to vector<8xf32>
      %48 = vector.shape_cast %47 : vector<8xf32> to vector<8x1xf32>
      %cst_22 = arith.constant 9.99999996E-13 : f32
      %49 = vector.broadcast %cst_22 : f32 to vector<8x1xf32>
      %50 = arith.maximumf %44, %49 : vector<8x1xf32>
      %51 = math.sqrt %50 : vector<8x1xf32>
      %cst_23 = arith.constant 9.99999996E-13 : f32
      %52 = vector.broadcast %cst_23 : f32 to vector<8x1xf32>
      %53 = arith.maximumf %48, %52 : vector<8x1xf32>
      %54 = math.sqrt %53 : vector<8x1xf32>
      %55 = arith.subf %51, %54 : vector<8x1xf32>
      %cst_24 = arith.constant 3.000000e-01 : f32
      %56 = vector.broadcast %cst_24 : f32 to vector<8x1xf32>
      %57 = arith.addf %55, %56 : vector<8x1xf32>
      %cst_25 = arith.constant 0.000000e+00 : f32
      %58 = vector.broadcast %cst_25 : f32 to vector<8x1xf32>
      %59 = arith.maximumf %57, %58 : vector<8x1xf32>
      %60 = vector.shape_cast %59 : vector<8x1xf32> to vector<1x8x1xf32>
      %cst_26 = arith.constant dense<0.000000e+00> : vector<1xf32>
      %61 = vector.multi_reduction <add>, %60, %cst_26 [1, 2] : vector<1x8x1xf32> to vector<1xf32>
      %62 = vector.shape_cast %61 : vector<1xf32> to vector<1x1x1xf32>
      %63 = vector.extract %62[0, 0, 0] : f32 from vector<1x1x1xf32>
      %cst_27 = arith.constant 8.000000e+00 : f32
      %64 = arith.divf %63, %cst_27 : f32
      %c0_28 = arith.constant 0 : index
      %65 = memref.load %arg3[%c0_28] : memref<1xf32, #tpu.memory_space<smem>>
      memref.store %64, %arg3[%c0_28] : memref<1xf32, #tpu.memory_space<smem>>
      %66 = arith.cmpf oge, %54, %51 : vector<8x1xf32>
      %67 = arith.extui %66 : vector<8x1xi1> to vector<8x1xi32>
      %68 = vector.shape_cast %67 : vector<8x1xi32> to vector<1x8x1xi32>
      %cst_29 = arith.constant dense<0> : vector<1xi32>
      %69 = vector.multi_reduction <add>, %68, %cst_29 [1, 2] : vector<1x8x1xi32> to vector<1xi32>
      %70 = vector.shape_cast %69 : vector<1xi32> to vector<1x1x1xi32>
      %71 = vector.extract %70[0, 0, 0] : i32 from vector<1x1x1xi32>
      %c0_30 = arith.constant 0 : index
      %72 = memref.load %arg4[%c0_30] : memref<1xi32, #tpu.memory_space<smem>>
      memref.store %71, %arg4[%c0_30] : memref<1xi32, #tpu.memory_space<smem>>
    } else {
    }
    return
  }
  func.func @transform_0(%arg0: i32) -> (i32, i32) {
    %c0_i32 = arith.constant 0 : i32
    %c0_i32_0 = arith.constant 0 : i32
    %c0_i32_1 = arith.constant 0 : i32
    return %c0_i32, %c0_i32_0 : i32, i32
  }
  func.func @transform_1(%arg0: i32) -> (i32, i32) {
    %c0_i32 = arith.constant 0 : i32
    %c0_i32_0 = arith.constant 0 : i32
    return %c0_i32, %arg0 : i32, i32
  }
  func.func @transform_2(%arg0: i32) -> i32 {
    %c0_i32 = arith.constant 0 : i32
    %c0_i32_0 = arith.constant 0 : i32
    return %c0_i32 : i32
  }
  func.func @transform_3(%arg0: i32) -> i32 {
    %c0_i32 = arith.constant 0 : i32
    %c0_i32_0 = arith.constant 0 : i32
    return %c0_i32 : i32
  }
}

</mosaic_0001>

<bundles_post_ra>
// kernel: tpu_custom_call.1
= control target key start
LH: loop header
LB: loop body
LE: loop exit
PB: predicated region body
PF: predicated region fallthrough
CT: control target
= control target key end

     0   :  { %9 = vsyncpa [#allocation4], 0  ;;  %s664_s0 = inlined_call_operand.hbm [shape: f32[8,16], index: 0, kind: input, shape index: {}]   ;;  %s665_s1 = inlined_call_operand.hbm [shape: f32[16,384], index: 1, kind: input, shape index: {}]   ;;  %s666_s2 = inlined_call_operand.hbm [shape: f32[1], index: 2, kind: output, shape index: {0}]   ;;  %s667_s3 = inlined_call_operand.hbm [shape: s32[1], index: 3, kind: output, shape index: {1}]  }
   0x1   :  { %10 = vsyncpa [#allocation7], 0 }
   0x2   :  { %11 = vsyncpa [#allocation5], 0 }
   0x3   :  { %12 = vsyncpa [#allocation10], 0  ;;  %s572_s12 = smov [#allocation3]   ;;  %s573_s14 = smov [#allocation6]  }
   0x4   :  { %s19_s13 = sshll.u32 %s572_s12, 4  ;;  %s28_s15 = sshll.u32 %s573_s14, 4  ;;  %s20_s13 = int_to_ptr.vmem [resolvable:$true] %s19_s13  ;;  %s602_s15 = int_to_ptr.vmem [resolvable:$true] %s28_s15 }
   0x5   :  { %s500_s18 = scalar_lea.hbm %s664_s0, 128 }
   0x6   :  { %p501_p0 = scmp.ne.s32.totalorder %s664_s0, %s500_s18  ;;  %p504_p1 = scmp.lt.u32.totalorder %s500_s18, %s664_s0 }
   0x8   :  { %p506_p2 = pnand %p504_p1, %p501_p0 }
   0xa   :  { %509 = shalt.err (!%p506_p2)
}
   0xb   :  { %s510_s23 = scalar_lea.vmem %s20_s13, 128  ;;  %p515_p4 = scmp.lt.s32.totalorder %s20_s13, %s20_s13 }
   0xc   :  { %p511_p3 = scmp.ne.s32.totalorder %s20_s13, %s510_s23  ;;  %p516_p5 = scmp.lt.s32.totalorder %s510_s23, %s510_s23 }
   0xe   :  { %p517_p6 = por %p516_p5, %p515_p4 }
  0x10   :  { %p518_p7 = pnand %p517_p6, %p511_p3 }
  0x12   :  { %521 = shalt.err (!%p518_p7)
}
  0x13   :  { %22 = dma.hbm_to_vmem [thread:$0]  %s664_s0, 128, %s20_s13, [#allocation4]  }
  0x14   :  { %s522_s28 = scalar_lea.hbm %s665_s1, 768 }
  0x15   :  { %p523_p8 = scmp.ne.s32.totalorder %s665_s1, %s522_s28  ;;  %p526_p9 = scmp.lt.u32.totalorder %s522_s28, %s665_s1 }
  0x17   :  { %p528_p10 = pnand %p526_p9, %p523_p8 }
  0x19   :  { %531 = shalt.err (!%p528_p10)
}
  0x1a   :  { %s532_s6 = scalar_lea.vmem %s602_s15, 768  ;;  %p537_p12 = scmp.lt.s32.totalorder %s602_s15, %s602_s15 }
  0x1b   :  { %p533_p11 = scmp.ne.s32.totalorder %s602_s15, %s532_s6  ;;  %p538_p13 = scmp.lt.s32.totalorder %s532_s6, %s532_s6 }
  0x1d   :  { %p539_p0 = por %p538_p13, %p537_p12 }
  0x1f   :  { %p540_p1 = pnand %p539_p0, %p533_p11 }
  0x21   :  { %543 = shalt.err (!%p540_p1)
}
  0x22   :  { %s574_s0 = smov 384   ;;  %s575_s7 = smov 24  }
  0x23   :  { %34 = dma.hbm_to_vmem [thread:$0]  %s665_s1, 768, %s602_s15, [#allocation7], %s574_s0, %s574_s0, %s575_s7  }
  0x24   :  { %564 = dma.done.wait [#allocation4], 128  }
  0x25   :  { %565 = vsyncadd [#allocation4], 4294967168 }
  0x26   :  { %566 = dma.done.wait [#allocation7], 768  }
  0x27   :  { %567 = vsyncadd [#allocation7], 4294966528  ;;  %v576_v0 = vmov 0.0|0.0   ;;  %vm577_vm0 = vmmov 0   ;;  %v578_v1 = vmov 0.0   ;;  %v49_v2 = vld [vmem:[#allocation6 + $0x8] sm:$0xff]  ;;  %v348_v22 = vlaneseq }
  0x28   :  { %479 = vmatprep.subr.bf16.mxu1 %v576_v0  ;;  %467 = vmatprep.mubr.msk.f32.mxu1 %vm577_vm0, %v578_v1  ;;  %v52_v3 = vld [vmem:[#allocation6 + $0x20] sm:$0xff]  ;;  %v50_v4 = vld [vmem:[#allocation6 + $0x10] sm:$0xff]  ;;  %v53_v6 = vld [vmem:[#allocation6 + $0x28] sm:$0xff]  ;;  %vm54_vm1 = vcmask 130048   ;;  %vm45_vm2 = vcmask 64512   ;;  %vm401_vm14 = vcmask 7168  }
  0x29   :  { %122 = vmatprep.mubr.f32.mxu0 %v578_v1  ;;  %v475_v5 = vpack.c.bf16 %v52_v3, %v49_v2  ;;  %v48_v7 = vld [vmem:[#allocation6] sm:$0xff]  ;;  %v51_v8 = vld [vmem:[#allocation6 + $0x18] sm:$0xff]  ;;  %v480_v9 = vpack.c.bf16 %v53_v6, %v50_v4  ;;  %46 = vst.msk [vmem:[#allocation2] sm:$0xff] %vm45_vm2, %v578_v1  ;;  %v349_v24 = vshrl.u32 %v348_v22, 7  ;;  %v351_v25 = vand.u32 127, %v348_v22  ;;  %s544_s14 = scalar_lea.hbm %s666_s2, 16 }
  0x2a   :  { %v477_v10 = vpack.c.bf16 %v51_v8, %v48_v7  ;;  %v47_v11 = vld [vmem:[#allocation3] sm:$0xff]  ;;  %v579_v0 = vmov 0   ;;  %p545_p2 = scmp.ne.s32.totalorder %s666_s2, %s544_s14  ;;  %p548_p3 = scmp.lt.u32.totalorder %s544_s14, %s666_s2 }
  0x2b   :  { %476 = vmatprep.subr.bf16.mxu0 %v475_v5  ;;  %481 = vmatpush3.bf16.msra.mxu1 %v480_v9  ;;  %vm352_vm3 = vcmp.eq.s32.totalorder %v349_v24, %v351_v25  ;;  %v368_v35 = vsub.s32 %v349_v24, %v351_v25 }
  0x2c   :  { %478 = vmatpush1.bf16.msra.mxu0 %v477_v10  ;;  %470 = vmatprep.subr.mxu1 %v578_v1  ;;  %v457_v27 = vsel %vm352_vm3, 1.0, %v578_v1  ;;  %p550_p4 = pnand %p548_p3, %p545_p2 }
  0x2d   :  { %vm369_vm4 = vcmp.eq.s32.totalorder %v368_v35, 0  ;;  %vm370_vm5 = vcmp.eq.s32.totalorder %v368_v35, 4  ;;  %vm372_vm7 = vcmp.eq.s32.totalorder %v368_v35, 4294967292 }
  0x2e   :  { %468 = vmatmul.mubr.msk.f32.vlgmr.msra.gmra.mrb[0].mxu1 %vm54_vm1, %v47_v11  ;;  %vm371_vm6 = vmor %vm369_vm4, %vm370_vm5 }
  0x2f   :  { %455 = vmatmul.mubr.msk.f32.vlgmr.msra.gmra.mrb[0].mxu0 %vm54_vm1, %v47_v11  ;;  %472 = vmatprep.mubr.msk.f32.mxu1 %vm577_vm0, %v578_v1  ;;  %vm373_vm8 = vmor %vm371_vm6, %vm372_vm7 }
  0x30   :  { %v199_v18 = vld [vmem:[#allocation2] sm:$0xff] }
 0x101   :  { %v195_v12 = vpop.f32.mrb[0].mxu1 }
 0x102   :  { %v124_v13 = vpop.f32.mrb[0].mxu0  ;;  %471 = vmatpush3.xpose.msra.mxu1 %v195_v12  ;;  %v469_v15 = vpop.f32.mrb[1].mxu1 }
 0x103   :  { %v126_v14 = vpop.f32.mrb[1].mxu0 }
 0x104   :  { %200 = vmatprep.subr.mxu0 %v126_v14  ;;  %264 = vmatprep.mubr.f32.mxu0 %v126_v14 }
 0x105   :  { %201 = vmatpush1.xpose.msra.mxu0 %v124_v13  ;;  %473 = vmatmul.mubr.f32.vlgmr.msra.gmra.mrb[2].mxu1 %v195_v12 }
 0x108   :  { %265 = vmatmul.mubr.f32.vlgmr.msra.gmra.mrb[2].mxu0 %v124_v13 }
 0x1d8   :  { %v336_v16 = vpop.f32.mrb[2].mxu1 }
 0x1d9   :  { %v474_v17 = vpop.f32.mrb[3].mxu1 }
 0x1db   :  { %v266_v19 = vpop.f32.mrb[2].mxu0 }
 0x1dc   :  { %v337_v20 = vadd.f32 %v336_v16, %v266_v19  ;;  %v268_v21 = vpop.f32.mrb[3].mxu0 }
 0x1de   :  { %v340_v23 = vadd.f32 %v337_v20, %v199_v18 }
 0x1e0   :  { %342 = vst.msk [vmem:[#allocation2] sm:$0xff] %vm45_vm2, %v340_v23 }
 0x1e7   :  { %v346_v26 = vld [vmem:[#allocation2] sm:$0xff] }
 0x1e8   :  { %v347_v28 = vmul.f32 0.25, %v346_v26 }
 0x1ea   :  { %v355_v29 = vmul.f32 %v457_v27, %v347_v28  ;;  %v366_v39 = vmul.f32 2.0, %v347_v28 }
 0x1ec   :  { %v356_v30 = vsel %vm45_vm2, %v355_v29, 0.0 }
 0x1ed   :  { %357 = vadd.xlane.f32.xlu0 %v356_v30  ;;  %v359_v31 = vrot.slane %v356_v30, 4 }
 0x1ef   :  { %v360_v32 = vadd.f32 %v359_v31, %v356_v30 }
 0x1f1   :  { %v361_v33 = vrot.slane %v360_v32, 2 }
 0x1f3   :  { %v362_v34 = vadd.f32 %v361_v33, %v360_v32 }
 0x1f5   :  { %v363_v36 = vrot.slane %v362_v34, 1 }
 0x1f7   :  { %v364_v37 = vadd.f32 %v363_v36, %v362_v34 }
 0x27a   :  { %v358_v38 = vpop.xlane.xlu0 %357 }
 0x27b   :  { %v365_v40 = vadd.f32 %v364_v37, %v358_v38 }
 0x27d   :  { %v367_v41 = vsub.f32 %v365_v40, %v366_v39 }
 0x27f   :  { %v378_v42 = vsel %vm373_vm8, inf, %v367_v41  ;;  %v374_v43 = vsel %vm373_vm8, %v367_v41, -inf }
 0x280   :  { %v379_v44 = vsel %vm45_vm2, %v378_v42, inf  ;;  %v375_v45 = vsel %vm45_vm2, %v374_v43, -inf }
 0x281   :  { %380 = vmin.xlane.f32.xlu1 %v379_v44  ;;  %376 = vmax.xlane.f32.xlu0 %v375_v45 }
 0x30e   :  { %v381_v46 = vpop.xlane.xlu1 %380  ;;  %v377_v47 = vpop.xlane.xlu0 %376 }
 0x30f   :  { %v390_v48 = vmax.f32 %v381_v46, 1e-12  ;;  %v382_v49 = vmax.f32 %v377_v47, 1e-12 }
 0x311   :  { %496 = vrsqrt.f32 %v390_v48  ;;  %vm393_vm9 = vcmp.eq.f32.partialorder %v390_v48, inf  ;;  %v396_v54 = vand.u32 2147483648, %v390_v48  ;;  %vm385_vm10 = vcmp.eq.f32.partialorder %v382_v49, inf }
 0x312   :  { %498 = vrsqrt.f32 %v382_v49  ;;  %v388_v55 = vand.u32 2147483648, %v382_v49  ;;  %vm395_vm11 = vcmp.eq.f32.partialorder %v390_v48, 0.0  ;;  %vm387_vm12 = vcmp.eq.f32.partialorder %v382_v49, 0.0 }
 0x31b   :  { %v497_v50 = vpop.eup %496 }
 0x31c   :  { %v499_v51 = vpop.eup %498  ;;  %v392_v52 = vmul.f32 %v497_v50, %v390_v48 }
 0x31d   :  { %v384_v53 = vmul.f32 %v499_v51, %v382_v49 }
 0x31e   :  { %v394_v56 = vsel %vm393_vm9, %v390_v48, %v392_v52 }
 0x31f   :  { %v386_v57 = vsel %vm385_vm10, %v382_v49, %v384_v53  ;;  %v397_v58 = vsel %vm395_vm11, %v396_v54, %v394_v56 }
 0x320   :  { %v389_v59 = vsel %vm387_vm12, %v388_v55, %v386_v57 }
 0x321   :  { %v398_v60 = vsub.f32 %v389_v59, %v397_v58  ;;  %vm417_vm13 = vcmp.ge.f32.partialorder %v397_v58, %v389_v59 }
 0x322   :  { %v418_v1 = vsel %vm417_vm13, 1, %v579_v0 }
 0x323   :  { %v399_v61 = vadd.f32 0.3, %v398_v60  ;;  %v419_v2 = vrot.slane %v418_v1, 4 }
 0x325   :  { %v400_v62 = vmax.f32 %v399_v61, 0.0  ;;  %v420_v3 = vadd.s32 %v419_v2, %v418_v1 }
 0x327   :  { %v402_v63 = vsel %vm401_vm14, %v400_v62, 0.0  ;;  %v421_v5 = vrot.slane %v420_v3, 2 }
 0x328   :  { %403 = vadd.xlane.f32.xlu1 %v402_v63 }
 0x329   :  { %v422_v8 = vadd.s32 %v421_v5, %v420_v3 }
 0x32b   :  { %v423_v11 = vrot.slane %v422_v8, 1 }
 0x32d   :  { %v424_v14 = vadd.s32 %v423_v11, %v422_v8 }
 0x3b5   :  { %v404_v4 = vpop.xlane.xlu1 %403 }
 0x3b6   :  { %v405_v6 = vrot.slane %v404_v4, 4 }
 0x3b8   :  { %v406_v7 = vadd.f32 %v405_v6, %v404_v4 }
 0x3ba   :  { %v407_v9 = vrot.slane %v406_v7, 2 }
 0x3bc   :  { %v408_v10 = vadd.f32 %v407_v9, %v406_v7 }
 0x3be   :  { %v409_v12 = vrot.slane %v408_v10, 1 }
 0x3c0   :  { %v410_v13 = vadd.f32 %v409_v12, %v408_v10 }
 0x3c2   :  { %482 = vpush %v410_v13 }
 0x3c3   :  { %484 = vpush %v424_v14 }
 0x3f3   :  { %s483_s1 = spop %482 }
 0x3f4   :  { %s414_s10 = smul.f32 0.125, %s483_s1  ;;  %s485_s11 = spop %484 }
 0x3f5   :  { %427 = sst [smem:[#allocation9]] %s485_s11 }
 0x3f6   :  { %416 = sst [smem:[#allocation8]] %s414_s10 }
 0x3f7   :  { %553 = shalt.err (!%p550_p4)
}
 0x3f8   :  { %s580_s19 = smov [#allocation8]   ;;  %s554_s24 = scalar_lea.hbm %s667_s3, 16 }
 0x3f9   :  { %435 = dma.smem_to_hbm %s580_s19, 16, %s666_s2, [#allocation5]  }
 0x3fa   :  { %p555_p5 = scmp.ne.s32.totalorder %s667_s3, %s554_s24  ;;  %p558_p6 = scmp.lt.u32.totalorder %s554_s24, %s667_s3 }
 0x3fc   :  { %p560_p7 = pnand %p558_p6, %p555_p5 }
 0x3fe   :  { %563 = shalt.err (!%p560_p7)
}
 0x3ff   :  { %s581_s29 = smov [#allocation9]  }
 0x400   :  { %443 = dma.smem_to_hbm %s581_s29, 16, %s667_s3, [#allocation10]  }
 0x401   :  { %568 = dma.done.wait [#allocation5], 16  }
 0x402   :  { %569 = vsyncadd [#allocation5], 4294967280 }
 0x403   :  { %570 = dma.done.wait [#allocation10], 16  }
 0x404   :  { %571 = vsyncadd [#allocation10], 4294967280 }
 0x405   :  { %450 = sfence }
 0x406   :  { %451 = vsyncpa [#allocation4], 1 }
 0x407   :  { %452 = vsyncpa [#allocation7], 1 }
 0x408   :  { %453 = vsyncpa [#allocation5], 1 }
 0x409   :  { %454 = vsyncpa [#allocation10], 1 }

</bundles_post_ra>
